<compile_context>
chip_gen: v7x
topology: tpu7x:2x2x1
jax: 0.10.0
libtpu: 0.0.40
codegen_flags: <defaults>
</compile_context>

<pallas_src>
import functools

import jax
import jax.numpy as jnp
from jax.experimental import pallas as pl
from jax.experimental.pallas import tpu as pltpu

_LANES = 128
_MAX_TILE_ROWS = 512  # f32 rows per tile (512 * 128 * 4B = 256 KiB per buffer)


def _dropout_kernel(seed_ref, x_ref, o_ref, *, p, tile_rows):
    """Inverted dropout on one (tm, 128) tile using a counter-based hash PRNG."""
    tm, lanes = x_ref.shape

    # Global element index of every lane in this tile (grid-invariant mask).
    row_base = (pl.program_id(0) * tile_rows).astype(jnp.uint32)
    rows = jax.lax.broadcasted_iota(jnp.uint32, (tm, lanes), 0)
    cols = jax.lax.broadcasted_iota(jnp.uint32, (tm, lanes), 1)
    idx = (rows + row_base) * jnp.uint32(lanes) + cols

    # splitmix/murmur3-style 32-bit mix, keyed by the SMEM seed.
    seed = seed_ref[0].astype(jnp.uint32)
    h = idx ^ (seed * jnp.uint32(0x9E3779B9))
    h = h ^ (h >> jnp.uint32(16))
    h = h * jnp.uint32(0x85EBCA6B)
    h = h ^ (h >> jnp.uint32(13))
    h = h * jnp.uint32(0xC2B2AE35)
    h = h ^ (h >> jnp.uint32(16))

    # Top 23 bits -> uniform [0, 1) (exact uint -> f32 conversion range).
    u = (h >> jnp.uint32(9)).astype(jnp.float32) * jnp.float32(1.0 / (1 << 23))

    keep = (u >= jnp.float32(p)).astype(jnp.float32)   # keep with prob (1 - p)
    scale = jnp.float32(1.0 / (1.0 - p))
    o_ref[...] = x_ref[...] * (keep * scale)


def custom_dropout(x, p, seed, training=True):
    """Pallas equivalent of CustomDropout(p)(x)."""
    if p == 0.0 or not training:
        # directreturn / eval-mode nn.Dropout: identity.
        return x
    if p >= 1.0:
        # nn.Dropout(p=1) zeroes everything.
        return jnp.zeros_like(x)

    orig_shape = x.shape
    orig_dtype = x.dtype
    n = x.size

    # Lane-dense layout: flatten to (rows, 128), rows padded to the tile size.
    rows = pl.cdiv(n, _LANES)
    tm = min(_MAX_TILE_ROWS, ((rows + 7) // 8) * 8)   # multiple of 8 sublanes
    rows_padded = ((rows + tm - 1) // tm) * tm
    n_padded = rows_padded * _LANES

    xf = x.reshape(-1).astype(jnp.float32)
    if n_padded != n:
        xf = jnp.pad(xf, (0, n_padded - n))
    x2 = xf.reshape(rows_padded, _LANES)

    seed_arr = jnp.asarray([seed], dtype=jnp.int32)
    grid = (rows_padded // tm,)

    kernel = functools.partial(_dropout_kernel, p=float(p), tile_rows=tm)

    y2 = pl.pallas_call(
        kernel,
        out_shape=jax.ShapeDtypeStruct((rows_padded, _LANES), jnp.float32),
        grid_spec=pltpu.PrefetchScalarGridSpec(
            num_scalar_prefetch=1,                      # seed lives in SMEM
            grid=grid,
            in_specs=[pl.BlockSpec((tm, _LANES), lambda i, seed: (i, 0))],
            out_specs=pl.BlockSpec((tm, _LANES), lambda i, seed: (i, 0)),
        ),
        compiler_params=pltpu.CompilerParams(
            dimension_semantics=("parallel",),          # shard across TCs on v7x
            vmem_limit_bytes=32 * 1024 * 1024,          # safe on v5e/v6e/v7x
        ),
        cost_estimate=pl.CostEstimate(
            flops=10 * n_padded,                        # hash + compare + scale
            transcendentals=0,
            bytes_accessed=2 * n_padded * 4,            # read x + write y
        ),
    )(seed_arr, x2)

    return y2.reshape(-1)[:n].reshape(orig_shape).astype(orig_dtype)


if __name__ == "__main__":
    batch, seq, hidden = 2, 8, 32
    key = jax.random.PRNGKey(0)
    x = jax.random.normal(key, (batch, seq, hidden), dtype=jnp.float32)

    # --- p == 0 path: directreturn (identity) ---
    y_identity = custom_dropout(x, p=0.0, seed=0, training=True)
    y_identity = jax.block_until_ready(y_identity)
    assert y_identity.shape == x.shape
    assert bool(jnp.all(y_identity == x)), "p=0 path must be identity"

    # --- p > 0 path: inverted dropout via the Pallas kernel ---
    p = 0.5
    y = custom_dropout(x, p=p, seed=1234, training=True)
    y = jax.block_until_ready(y)
    assert y.shape == x.shape

    scale = 1.0 / (1.0 - p)
    dropped = jnp.isclose(y, 0.0, atol=1e-6)
    kept = jnp.isclose(y, x * scale, rtol=1e-5, atol=1e-6)

    # Every element is either zeroed or scaled by 1/(1-p).
    assert bool(jnp.all(dropped | kept)), "dropout output not in {0, x/(1-p)}"

    # Empirical keep rate should be near (1 - p). 512 elements -> loose band.
    keep_rate = float(jnp.mean(kept.astype(jnp.float32)))
    assert 0.25 < keep_rate < 0.75, f"keep rate {keep_rate} far from 1-p={1-p}"

    # Same seed -> same mask (deterministic, tiling-independent hash PRNG).
    y_again = custom_dropout(x, p=p, seed=1234, training=True)
    assert bool(jnp.all(jax.block_until_ready(y_again) == y))

    # Eval mode is identity as well.
    y_eval = custom_dropout(x, p=p, seed=7, training=False)
    assert bool(jnp.all(jax.block_until_ready(y_eval) == x))

    print("KERNEL_OK")
</pallas_src>

<mosaic_0001>
module attributes {stable_mosaic.version = 11 : i64} {
  func.func @_dropout_kernel(%arg0: i32, %arg1: memref<1xi32, #tpu.memory_space<smem>>, %arg2: memref<8x128xf32, #tpu.memory_space<vmem>>, %arg3: memref<8x128xf32, #tpu.memory_space<vmem>>) attributes {dimension_semantics = [#tpu.dimension_semantics<parallel>], iteration_bounds = array<i64: 1>, scalar_prefetch = 1 : i64, scratch_operands = 0 : i64, tpu.core_type = #tpu.core_type<tc>, window_params = [{transform_indices = @transform_0, window_bounds = array<i64: 8, 128>}, {transform_indices = @transform_1, window_bounds = array<i64: 8, 128>}]} {
    %c8_i32 = arith.constant 8 : i32
    %0 = arith.muli %arg0, %c8_i32 : i32
    %1 = tpu.iota {dimensions = array<i32: 0>} : vector<8x128xi32>
    %2 = tpu.iota {dimensions = array<i32: 1>} : vector<8x128xi32>
    %3 = vector.broadcast %0 : i32 to vector<8x128xi32>
    %4 = arith.addi %1, %3 : vector<8x128xi32>
    %c128_i32 = arith.constant 128 : i32
    %5 = vector.broadcast %c128_i32 : i32 to vector<8x128xi32>
    %6 = arith.muli %4, %5 : vector<8x128xi32>
    %7 = arith.addi %6, %2 : vector<8x128xi32>
    %c0 = arith.constant 0 : index
    %8 = memref.load %arg1[%c0] : memref<1xi32, #tpu.memory_space<smem>>
    %c-1640531527_i32 = arith.constant -1640531527 : i32
    %9 = arith.muli %8, %c-1640531527_i32 : i32
    %10 = vector.broadcast %9 : i32 to vector<8x128xi32>
    %11 = arith.xori %7, %10 : vector<8x128xi32>
    %c16_i32 = arith.constant 16 : i32
    %12 = vector.broadcast %c16_i32 : i32 to vector<8x128xi32>
    %13 = arith.shrui %11, %12 : vector<8x128xi32>
    %14 = arith.xori %11, %13 : vector<8x128xi32>
    %c-2048144789_i32 = arith.constant -2048144789 : i32
    %15 = vector.broadcast %c-2048144789_i32 : i32 to vector<8x128xi32>
    %16 = arith.muli %14, %15 : vector<8x128xi32>
    %c13_i32 = arith.constant 13 : i32
    %17 = vector.broadcast %c13_i32 : i32 to vector<8x128xi32>
    %18 = arith.shrui %16, %17 : vector<8x128xi32>
    %19 = arith.xori %16, %18 : vector<8x128xi32>
    %c-1028477387_i32 = arith.constant -1028477387 : i32
    %20 = vector.broadcast %c-1028477387_i32 : i32 to vector<8x128xi32>
    %21 = arith.muli %19, %20 : vector<8x128xi32>
    %c16_i32_0 = arith.constant 16 : i32
    %22 = vector.broadcast %c16_i32_0 : i32 to vector<8x128xi32>
    %23 = arith.shrui %21, %22 : vector<8x128xi32>
    %24 = arith.xori %21, %23 : vector<8x128xi32>
    %c9_i32 = arith.constant 9 : i32
    %25 = vector.broadcast %c9_i32 : i32 to vector<8x128xi32>
    %26 = arith.shrui %24, %25 : vector<8x128xi32>
    %27 = arith.uitofp %26 : vector<8x128xi32> to vector<8x128xf32>
    %cst = arith.constant 1.1920929E-7 : f32
    %28 = vector.broadcast %cst : f32 to vector<8x128xf32>
    %29 = arith.mulf %27, %28 : vector<8x128xf32>
    %cst_1 = arith.constant 5.000000e-01 : f32
    %30 = vector.broadcast %cst_1 : f32 to vector<8x128xf32>
    %31 = arith.cmpf oge, %29, %30 : vector<8x128xf32>
    %32 = arith.extui %31 : vector<8x128xi1> to vector<8x128xi32>
    %33 = arith.sitofp %32 : vector<8x128xi32> to vector<8x128xf32>
    %c0_2 = arith.constant 0 : index
    %c0_3 = arith.constant 0 : index
    %34 = vector.load %arg2[%c0_2, %c0_3] : memref<8x128xf32, #tpu.memory_space<vmem>>, vector<8x128xf32>
    %cst_4 = arith.constant 2.000000e+00 : f32
    %35 = vector.broadcast %cst_4 : f32 to vector<8x128xf32>
    %36 = arith.mulf %33, %35 : vector<8x128xf32>
    %37 = arith.mulf %34, %36 : vector<8x128xf32>
    %c0_5 = arith.constant 0 : index
    %c0_6 = arith.constant 0 : index
    %38 = vector.load %arg3[%c0_5, %c0_6] : memref<8x128xf32, #tpu.memory_space<vmem>>, vector<8x128xf32>
    tpu.vector_store %arg3[%c0_5, %c0_6], %37 {strides = array<i32>} : memref<8x128xf32, #tpu.memory_space<vmem>>, vector<8x128xf32>,
    return
  }
  func.func @transform_0(%arg0: i32, %arg1: memref<1xi32, #tpu.memory_space<smem>>) -> (i32, i32) {
    %c0_i32 = arith.constant 0 : i32
    %c0_i32_0 = arith.constant 0 : i32
    return %arg0, %c0_i32 : i32, i32
  }
  func.func @transform_1(%arg0: i32, %arg1: memref<1xi32, #tpu.memory_space<smem>>) -> (i32, i32) {
    %c0_i32 = arith.constant 0 : i32
    %c0_i32_0 = arith.constant 0 : i32
    return %arg0, %c0_i32 : i32, i32
  }
}

</mosaic_0001>

<bundles_post_ra>
// kernel: tpu_custom_call.1
= control target key start
LH: loop header
LB: loop body
LE: loop exit
PB: predicated region body
PF: predicated region fallthrough
CT: control target
= control target key end

     0   :  { %8 = vsyncpa [#allocation5], 0  ;;  %s171_s0 = inlined_call_operand.<no memory space> [shape: s32[1], index: 0, kind: input, shape index: {}]   ;;  %s172_s1 = inlined_call_operand.hbm [shape: f32[8,128], index: 1, kind: input, shape index: {}]   ;;  %s173_s2 = inlined_call_operand.hbm [shape: f32[8,128], index: 2, kind: output, shape index: {}]  }
   0x1   :  { %9 = vsyncpa [#allocation6], 0  ;;  %s126_s9 = smov [#allocation4]   ;;  %s78_s13 = scalar_lea.hbm %s172_s1, 128 }
   0x2   :  { %s16_s10 = sshll.u32 %s126_s9, 4  ;;  %p79_p0 = scmp.ne.s32.totalorder %s172_s1, %s78_s13  ;;  %s17_s10 = int_to_ptr.vmem [resolvable:$true] %s16_s10 }
   0x3   :  { %p82_p1 = scmp.lt.u32.totalorder %s78_s13, %s172_s1 }
   0x5   :  { %p84_p2 = pnand %p82_p1, %p79_p0 }
   0x7   :  { %87 = shalt.err (!%p84_p2)
}
   0x8   :  { %s88_s18 = scalar_lea.vmem %s17_s10, 128  ;;  %p93_p4 = scmp.lt.s32.totalorder %s17_s10, %s17_s10 }
   0x9   :  { %p89_p3 = scmp.ne.s32.totalorder %s17_s10, %s88_s18  ;;  %p94_p5 = scmp.lt.s32.totalorder %s88_s18, %s88_s18 }
   0xb   :  { %p95_p6 = por %p94_p5, %p93_p4 }
   0xd   :  { %p96_p7 = pnand %p95_p6, %p89_p3 }
   0xf   :  { %99 = shalt.err (!%p96_p7)
}
  0x10   :  { %19 = dma.hbm_to_vmem [thread:$0]  %s172_s1, 128, %s17_s10, [#allocation5]  }
  0x11   :  { %122 = dma.done.wait [#allocation5], 128  }
  0x12   :  { %123 = vsyncadd [#allocation5], 4294967168  ;;  %v24_v0 = vlaneseq  ;;  %s33_s23 = smul.u32 2654435769, %s171_s0  ;;  %v127_v23 = vmov 0.0   ;;  %v55_v25 = vld [vmem:[#allocation4] sm:$0xff] }
  0x13   :  { %s128_s0 = smov [#allocation7]  }
  0x14   :  { %v25_v1 = vshrl.u32 %v24_v0, 7  ;;  %v27_v2 = vand.u32 127, %v24_v0  ;;  %v34_v4 = vstv %s33_s23  ;;  %s65_s1 = sshll.u32 %s128_s0, 4  ;;  %s66_s1 = int_to_ptr.vmem [resolvable:$true] %s65_s1 }
  0x15   :  { %s100_s24 = scalar_lea.vmem %s66_s1, 128  ;;  %p105_p9 = scmp.lt.s32.totalorder %s66_s1, %s66_s1 }
  0x16   :  { %v30_v3 = vmul.u32 128, %v25_v1  ;;  %p101_p8 = scmp.ne.s32.totalorder %s66_s1, %s100_s24  ;;  %p106_p10 = scmp.lt.s32.totalorder %s100_s24, %s100_s24 }
  0x18   :  { %v31_v5 = vadd.s32 %v30_v3, %v27_v2  ;;  %p107_p11 = por %p106_p10, %p105_p9 }
  0x1a   :  { %v35_v6 = vxor.u32 %v34_v4, %v31_v5  ;;  %p108_p12 = pnand %p107_p11, %p101_p8 }
  0x1c   :  { %v36_v7 = vshrl.u32 %v35_v6, 16 }
  0x1e   :  { %v37_v8 = vxor.u32 %v36_v7, %v35_v6 }
  0x20   :  { %v38_v9 = vmul.u32 2246822507, %v37_v8 }
  0x22   :  { %v39_v10 = vshrl.u32 %v38_v9, 13 }
  0x24   :  { %v40_v11 = vxor.u32 %v39_v10, %v38_v9 }
  0x26   :  { %v41_v12 = vmul.u32 3266489909, %v40_v11 }
  0x28   :  { %v42_v13 = vshrl.u32 %v41_v12, 16 }
  0x2a   :  { %v43_v14 = vxor.u32 %v42_v13, %v41_v12 }
  0x2c   :  { %v44_v15 = vshrl.u32 %v43_v14, 9 }
  0x2e   :  { %v45_v16 = vshrl.u32 %v44_v15, 16  ;;  %v46_v17 = vand.u32 65535, %v44_v15 }
  0x30   :  { %v47_v18 = vcvt.s32.f32 %v45_v16  ;;  %v49_v19 = vcvt.s32.f32 %v46_v17 }
  0x32   :  { %v48_v20 = vmul.f32 65536.0, %v47_v18 }
  0x34   :  { %v50_v21 = vadd.f32 %v49_v19, %v48_v20 }
  0x36   :  { %v51_v22 = vmul.f32 1.1920929e-07, %v50_v21 }
  0x38   :  { %vm52_vm0 = vcmp.ge.f32.partialorder %v51_v22, 0.5 }
  0x39   :  { %v74_v24 = vsel %vm52_vm0, 1.0, %v127_v23 }
  0x3a   :  { %v56_v26 = vmul.f32 2.0, %v74_v24 }
  0x3c   :  { %v57_v27 = vmul.f32 %v56_v26, %v55_v25 }
  0x3e   :  { %58 = vst [vmem:[#allocation7] sm:$0xff] %v57_v27 }
  0x3f   :  { %111 = shalt.err (!%p108_p12)
}
  0x40   :  { %s112_s27 = scalar_lea.hbm %s173_s2, 128 }
  0x41   :  { %p113_p13 = scmp.ne.s32.totalorder %s173_s2, %s112_s27  ;;  %p116_p0 = scmp.lt.u32.totalorder %s112_s27, %s173_s2 }
  0x43   :  { %p118_p1 = pnand %p116_p0, %p113_p13 }
  0x45   :  { %121 = shalt.err (!%p118_p1)
}
  0x46   :  { %68 = dma.vmem_to_hbm [thread:$0]  %s66_s1, 128, %s173_s2, [#allocation6]  }
  0x47   :  { %124 = dma.done.wait [#allocation6], 128  }
  0x48   :  { %125 = vsyncadd [#allocation6], 4294967168 }
  0x49   :  { %72 = vsyncpa [#allocation5], 1 }
  0x4a   :  { %73 = vsyncpa [#allocation6], 1 }

</bundles_post_ra>
